<compile_context>
chip_gen: v7x
topology: tpu7x:2x2x1
jax: 0.10.0
libtpu: 0.0.40
codegen_flags: <defaults>
</compile_context>

<pallas_src>
import functools

import jax
import jax.numpy as jnp
from jax.experimental import pallas as pl
from jax.experimental.pallas import tpu as pltpu

LANES = 128
SUBLANES = 8


def _const_pow(x, gamma):
    """x ** gamma with an integer-gamma fast path (avoids exp/log pow)."""
    g = float(gamma)
    if g.is_integer() and 0.0 <= g <= 8.0:
        gi = int(g)
        if gi == 0:
            return jnp.ones_like(x)
        r = x
        for _ in range(gi - 1):
            r = r * x
        return r
    return x ** g


def _focal_terms(x, t, alpha, gamma, *, in_kernel):
    """Per-element focal loss from f32 logits x and binary targets t."""
    e = jnp.exp(-jnp.abs(x))
    den = 1.0 + e
    log_den = jnp.log(den)
    # Fused, numerically stable BCE-with-logits.  The min() reproduces
    # torch.nn.functional.binary_cross_entropy's -100 log clamp exactly for
    # hard 0/1 targets (only differs for |x| > 100).
    bce = jnp.minimum(jnp.maximum(x, 0.0) - x * t + log_den, 100.0)
    if in_kernel:
        inv_den = pl.reciprocal(den, approx=True)   # EUP slot, VALU stays free
        p = jnp.where(x >= 0.0, inv_den, e * inv_den)       # sigmoid(x)
    else:
        p = jnp.where(x >= 0.0, 1.0 / den, e / den)
    is_pos = t == 1.0
    one_minus_pt = jnp.where(is_pos, 1.0 - p, p)             # 1 - pt
    alpha_w = jnp.where(is_pos, alpha, 1.0 - alpha)
    return alpha_w * _const_pow(one_minus_pt, gamma) * bce


def _focal_kernel(x_ref, t_ref, partial_ref, *, alpha, gamma, chunk_rows):
    """One (tile_rows, 128) block -> (8, 128) partial focal-loss sum.

    Compute is chunked over (chunk_rows, 128) sub-slices so all temporaries
    stay in vregs instead of round-tripping VMEM.
    """
    tile_rows = x_ref.shape[0]
    num_chunks = tile_rows // chunk_rows

    def chunk_sum(c, acc):
        start = c * chunk_rows
        if not isinstance(start, int):
            start = pl.multiple_of(start, chunk_rows)
        x = x_ref[pl.ds(start, chunk_rows), :].astype(jnp.float32)
        t = t_ref[pl.ds(start, chunk_rows), :].astype(jnp.float32)
        focal = _focal_terms(x, t, alpha, gamma, in_kernel=True)
        # (chunk_rows, 128) -> (8, 128): rows fold onto sublanes in groups of
        # 8, so this is a pure VPU vreg add (no XLU shuffle).
        return acc + jnp.sum(
            focal.reshape(chunk_rows // SUBLANES, SUBLANES, LANES), axis=0)

    acc0 = jnp.zeros((SUBLANES, LANES), jnp.float32)
    if num_chunks == 1:
        partial_ref[...] = chunk_sum(0, acc0)
    else:
        if num_chunks <= 8:
            unroll = num_chunks
        else:
            unroll = next((u for u in (8, 4, 2) if num_chunks % u == 0), 1)
        partial_ref[...] = jax.lax.fori_loop(
            0, num_chunks, chunk_sum, acc0, unroll=unroll)


def _pick_tiling(rows, max_tile_rows, chunk_rows):
    """Pick (tile_rows, chunk_rows): both multiples of 8, tile a multiple of
    chunk, and >= 2 grid steps whenever the input allows it (v7x dual-TC)."""
    chunk = max(SUBLANES, (min(chunk_rows, rows) // SUBLANES) * SUBLANES)
    tile = max(chunk, (min(max_tile_rows, rows) // chunk) * chunk)
    if rows // tile < 2 and rows >= 2 * chunk:
        tile = max(chunk, ((rows // 2) // chunk) * chunk)
    return tile, chunk


def binary_focal_loss(predictions, targets, *, alpha=0.25, gamma=2.0,
                      reduction="mean", max_tile_rows=2048, chunk_rows=32):
    """Pallas implementation of BinaryFocalLoss.forward.

    predictions: logits, any shape (e.g. [B, C, D, H, W]), any float dtype
    targets:     binary mask, same shape; pass in its native (narrow) dtype —
                 the kernel upcasts to f32 in VMEM, so no wrapper-side astype
                 (and no extra HBM pass) is needed.
    """
    assert predictions.shape == targets.shape
    if reduction not in ("mean", "sum"):
        # TODO(synk): reduction='none' (elementwise output) is not wired up.
        raise NotImplementedError("reduction must be 'mean' or 'sum'")

    alpha = float(alpha)
    gamma = float(gamma)
    n_valid = int(predictions.size)
    x_flat = predictions.reshape(-1)      # reshape of contiguous array: free
    t_flat = targets.reshape(-1)

    total = jnp.float32(0.0)
    n_main = 0
    rows = n_valid // LANES

    if n_valid % LANES == 0 and rows >= SUBLANES:
        tile_rows, c_rows = _pick_tiling(rows, int(max_tile_rows),
                                         int(chunk_rows))
        num_tiles = rows // tile_rows            # grid only covers this prefix
        n_main = num_tiles * tile_rows * LANES

        x2d = x_flat.reshape(rows, LANES)        # zero-copy 2-D lane view
        t2d = t_flat.reshape(rows, LANES)

        kernel = functools.partial(_focal_kernel, alpha=alpha, gamma=gamma,
                                   chunk_rows=c_rows)
        cost = pl.CostEstimate(
            flops=25 * n_main,
            transcendentals=3 * n_main,
            bytes_accessed=n_main * (x2d.dtype.itemsize + t2d.dtype.itemsize)
            + num_tiles * SUBLANES * LANES * 4)

        partials = pl.pallas_call(
            kernel,
            out_shape=jax.ShapeDtypeStruct((num_tiles, SUBLANES, LANES),
                                           jnp.float32),
            grid_spec=pltpu.PrefetchScalarGridSpec(
                num_scalar_prefetch=0,
                grid=(num_tiles,),
                in_specs=[
                    pl.BlockSpec((tile_rows, LANES), lambda i: (i, 0)),
                    pl.BlockSpec((tile_rows, LANES), lambda i: (i, 0)),
                ],
                out_specs=pl.BlockSpec((None, SUBLANES, LANES),
                                       lambda i: (i, 0, 0)),
            ),
            compiler_params=pltpu.CompilerParams(
                dimension_semantics=("parallel",),
                vmem_limit_bytes=32 * 1024 * 1024,
            ),
            cost_estimate=cost,
        )(x2d, t2d)
        total = jnp.sum(partials)

    # Ragged remainder (rows not covered by the grid and/or a sub-128 element
    # tail): a tiny suffix slice summed with fused pure JAX — never a
    # full-array pad/copy.
    # TODO(synk): a 1-D-block kernel variant would let flat sizes that are not
    # a multiple of 128 avoid this pure-JAX fallback entirely.
    if n_main < n_valid:
        x_tail = x_flat[n_main:].astype(jnp.float32)
        t_tail = t_flat[n_main:].astype(jnp.float32)
        total = total + jnp.sum(
            _focal_terms(x_tail, t_tail, alpha, gamma, in_kernel=False))

    if reduction == "mean":
        return total / jnp.float32(n_valid)
    return total


def _reference(predictions, targets, alpha=0.25, gamma=2.0, reduction="mean"):
    """Pure-JAX mirror of the PyTorch module (torch-style -100 log clamp)."""
    p = jax.nn.sigmoid(predictions.astype(jnp.float32))
    t = targets.astype(jnp.float32)
    log_p = jnp.maximum(jnp.log(p), -100.0)
    log_1mp = jnp.maximum(jnp.log(1.0 - p), -100.0)
    bce = -(t * log_p + (1.0 - t) * log_1mp)
    pt = jnp.where(t == 1.0, p, 1.0 - p)
    aw = jnp.where(t == 1.0, alpha, 1.0 - alpha)
    fl = aw * (1.0 - pt) ** gamma * bce
    return jnp.mean(fl) if reduction == "mean" else jnp.sum(fl)


if __name__ == "__main__":
    key = jax.random.PRNGKey(0)
    k1, k2, k3, k4, k5, k6 = jax.random.split(key, 6)

    def check(shape, kp, kt, reduction="mean"):
        preds = jax.random.normal(kp, shape, dtype=jnp.float32) * 2.0
        targs = (jax.random.uniform(kt, shape) < 0.1).astype(jnp.float32)
        got = jax.block_until_ready(
            binary_focal_loss(preds, targs, alpha=0.25, gamma=2.0,
                              reduction=reduction))
        want = _reference(preds, targs, reduction=reduction)
        # rtol loosened slightly for pl.reciprocal(approx=True).
        assert jnp.allclose(got, want, rtol=1e-3, atol=1e-6), (shape, got, want)

    # [B, C, D, H, W]: single-tile, single-chunk, fully zero-copy path.
    check((2, 1, 4, 16, 16), k1, k2)
    # Row remainder: rows=20 -> one 16-row tile + 4-row pure-JAX suffix.
    check((2, 1, 5, 16, 16), k3, k4)
    # Multi-tile grid (2 steps) + multi-chunk inner loop, reduction='sum'.
    check((2, 1, 8, 32, 32), k5, k6, reduction="sum")
    # Non-lane-aligned element count -> fused pure-JAX fallback (no pad).
    check((2, 1, 3, 5, 7), k1, k4)

    print("KERNEL_OK")
</pallas_src>

<mosaic_0001>
module attributes {stable_mosaic.version = 11 : i64} {
  func.func @_focal_kernel(%arg0: i32, %arg1: memref<16x128xf32, #tpu.memory_space<vmem>>, %arg2: memref<16x128xf32, #tpu.memory_space<vmem>>, %arg3: memref<1x8x128xf32, #tpu.memory_space<vmem>>) attributes {dimension_semantics = [#tpu.dimension_semantics<parallel>], iteration_bounds = array<i64: 1>, scalar_prefetch = 0 : i64, scratch_operands = 0 : i64, tpu.core_type = #tpu.core_type<tc>, window_params = [{transform_indices = @transform_0, window_bounds = array<i64: 16, 128>}, {transform_indices = @transform_1, window_bounds = array<i64: 16, 128>}, {transform_indices = @transform_2, window_bounds = array<i64: 1, 8, 128>}]} {
    %cst = arith.constant 0.000000e+00 : f32
    %0 = vector.broadcast %cst : f32 to vector<8x128xf32>
    %c0 = arith.constant 0 : index
    %c0_0 = arith.constant 0 : index
    %1 = vector.load %arg1[%c0, %c0_0] : memref<16x128xf32, #tpu.memory_space<vmem>>, vector<16x128xf32>
    %c0_1 = arith.constant 0 : index
    %c0_2 = arith.constant 0 : index
    %2 = vector.load %arg2[%c0_1, %c0_2] : memref<16x128xf32, #tpu.memory_space<vmem>>, vector<16x128xf32>
    %3 = math.absf %1 : vector<16x128xf32>
    %cst_3 = arith.constant 0.000000e+00 : f32
    %4 = vector.broadcast %cst_3 : f32 to vector<16x128xf32>
    %5 = arith.subf %4, %3 : vector<16x128xf32>
    %6 = math.exp %5 : vector<16x128xf32>
    %cst_4 = arith.constant 1.000000e+00 : f32
    %7 = vector.broadcast %cst_4 : f32 to vector<16x128xf32>
    %8 = arith.addf %7, %6 : vector<16x128xf32>
    %9 = math.log %8 : vector<16x128xf32>
    %cst_5 = arith.constant 0.000000e+00 : f32
    %10 = vector.broadcast %cst_5 : f32 to vector<16x128xf32>
    %11 = arith.maximumf %1, %10 : vector<16x128xf32>
    %12 = arith.mulf %1, %2 : vector<16x128xf32>
    %13 = arith.subf %11, %12 : vector<16x128xf32>
    %14 = arith.addf %13, %9 : vector<16x128xf32>
    %cst_6 = arith.constant 1.000000e+02 : f32
    %15 = vector.broadcast %cst_6 : f32 to vector<16x128xf32>
    %16 = arith.minimumf %14, %15 : vector<16x128xf32>
    %17 = tpu.reciprocal %8 {approx = true} : vector<16x128xf32> -> vector<16x128xf32>
    %cst_7 = arith.constant 0.000000e+00 : f32
    %18 = vector.broadcast %cst_7 : f32 to vector<16x128xf32>
    %19 = arith.cmpf oge, %1, %18 : vector<16x128xf32>
    %20 = arith.mulf %6, %17 : vector<16x128xf32>
    %21 = arith.select %19, %17, %20 : vector<16x128xi1>, vector<16x128xf32>
    %cst_8 = arith.constant 1.000000e+00 : f32
    %22 = vector.broadcast %cst_8 : f32 to vector<16x128xf32>
    %23 = arith.cmpf oeq, %2, %22 : vector<16x128xf32>
    %cst_9 = arith.constant 1.000000e+00 : f32
    %24 = vector.broadcast %cst_9 : f32 to vector<16x128xf32>
    %25 = arith.subf %24, %21 : vector<16x128xf32>
    %26 = arith.select %23, %25, %21 : vector<16x128xi1>, vector<16x128xf32>
    %cst_10 = arith.constant 2.500000e-01 : f32
    %cst_11 = arith.constant 7.500000e-01 : f32
    %27 = vector.broadcast %cst_10 : f32 to vector<16x128xf32>
    %28 = vector.broadcast %cst_11 : f32 to vector<16x128xf32>
    %29 = arith.select %23, %27, %28 : vector<16x128xi1>, vector<16x128xf32>
    %30 = arith.mulf %26, %26 : vector<16x128xf32>
    %31 = arith.mulf %29, %30 : vector<16x128xf32>
    %32 = arith.mulf %31, %16 : vector<16x128xf32>
    %33 = vector.shape_cast %32 : vector<16x128xf32> to vector<2x8x128xf32>
    %cst_12 = arith.constant dense<0.000000e+00> : vector<8x128xf32>
    %34 = vector.multi_reduction <add>, %33, %cst_12 [0] : vector<2x8x128xf32> to vector<8x128xf32>
    %35 = arith.addf %0, %34 : vector<8x128xf32>
    %c0_13 = arith.constant 0 : index
    %c0_14 = arith.constant 0 : index
    %c0_15 = arith.constant 0 : index
    %36 = vector.load %arg3[%c0_13, %c0_14, %c0_15] : memref<1x8x128xf32, #tpu.memory_space<vmem>>, vector<1x8x128xf32>
    %37 = vector.shape_cast %36 : vector<1x8x128xf32> to vector<8x128xf32>
    %38 = vector.shape_cast %35 : vector<8x128xf32> to vector<1x8x128xf32>
    tpu.vector_store %arg3[%c0_13, %c0_14, %c0_15], %38 {strides = array<i32>} : memref<1x8x128xf32, #tpu.memory_space<vmem>>, vector<1x8x128xf32>,
    return
  }
  func.func @transform_0(%arg0: i32) -> (i32, i32) {
    %c0_i32 = arith.constant 0 : i32
    %c0_i32_0 = arith.constant 0 : i32
    return %arg0, %c0_i32 : i32, i32
  }
  func.func @transform_1(%arg0: i32) -> (i32, i32) {
    %c0_i32 = arith.constant 0 : i32
    %c0_i32_0 = arith.constant 0 : i32
    return %arg0, %c0_i32 : i32, i32
  }
  func.func @transform_2(%arg0: i32) -> (i32, i32, i32) {
    %c0_i32 = arith.constant 0 : i32
    %c0_i32_0 = arith.constant 0 : i32
    %c0_i32_1 = arith.constant 0 : i32
    return %arg0, %c0_i32, %c0_i32_0 : i32, i32, i32
  }
}

</mosaic_0001>

<bundles_post_ra>
// kernel: tpu_custom_call.1
= control target key start
LH: loop header
LB: loop body
LE: loop exit
PB: predicated region body
PF: predicated region fallthrough
CT: control target
= control target key end

     0   :  { %7 = vsyncpa [#allocation3], 0  ;;  %s256_s0 = inlined_call_operand.hbm [shape: f32[16,128], index: 0, kind: input, shape index: {}]   ;;  %s257_s1 = inlined_call_operand.hbm [shape: f32[16,128], index: 1, kind: input, shape index: {}]   ;;  %s258_s2 = inlined_call_operand.hbm [shape: f32[1,8,128], index: 2, kind: output, shape index: {}]  }
   0x1   :  { %8 = vsyncpa [#allocation6], 0 }
   0x2   :  { %9 = vsyncpa [#allocation4], 0  ;;  %s199_s9 = smov [#allocation2]   ;;  %s127_s13 = scalar_lea.hbm %s256_s0, 256 }
   0x3   :  { %s15_s10 = sshll.u32 %s199_s9, 4  ;;  %p128_p0 = scmp.ne.s32.totalorder %s256_s0, %s127_s13  ;;  %s16_s10 = int_to_ptr.vmem [resolvable:$true] %s15_s10 }
   0x4   :  { %p131_p1 = scmp.lt.u32.totalorder %s127_s13, %s256_s0 }
   0x6   :  { %p133_p2 = pnand %p131_p1, %p128_p0 }
   0x8   :  { %136 = shalt.err (!%p133_p2)
}
   0x9   :  { %s137_s18 = scalar_lea.vmem %s16_s10, 256  ;;  %p142_p4 = scmp.lt.s32.totalorder %s16_s10, %s16_s10 }
   0xa   :  { %p138_p3 = scmp.ne.s32.totalorder %s16_s10, %s137_s18  ;;  %p143_p5 = scmp.lt.s32.totalorder %s137_s18, %s137_s18 }
   0xc   :  { %p144_p6 = por %p143_p5, %p142_p4 }
   0xe   :  { %p145_p7 = pnand %p144_p6, %p138_p3 }
  0x10   :  { %148 = shalt.err (!%p145_p7)
}
  0x11   :  { %s200_s19 = smov 128   ;;  %s201_s20 = smov 8  }
  0x12   :  { %21 = dma.hbm_to_vmem [thread:$0]  %s256_s0, 256, %s16_s10, [#allocation3], %s200_s19, %s200_s19, %s201_s20  }
  0x13   :  { %s202_s23 = smov [#allocation5]   ;;  %s149_s27 = scalar_lea.hbm %s257_s1, 256 }
  0x14   :  { %s27_s24 = sshll.u32 %s202_s23, 4  ;;  %p150_p8 = scmp.ne.s32.totalorder %s257_s1, %s149_s27  ;;  %s28_s24 = int_to_ptr.vmem [resolvable:$true] %s27_s24 }
  0x15   :  { %p153_p9 = scmp.lt.u32.totalorder %s149_s27, %s257_s1 }
  0x17   :  { %p155_p10 = pnand %p153_p9, %p150_p8 }
  0x19   :  { %158 = shalt.err (!%p155_p10)
}
  0x1a   :  { %s159_s4 = scalar_lea.vmem %s28_s24, 256  ;;  %p164_p12 = scmp.lt.s32.totalorder %s28_s24, %s28_s24 }
  0x1b   :  { %p160_p11 = scmp.ne.s32.totalorder %s28_s24, %s159_s4  ;;  %p165_p13 = scmp.lt.s32.totalorder %s159_s4, %s159_s4 }
  0x1d   :  { %p166_p0 = por %p165_p13, %p164_p12 }
  0x1f   :  { %p167_p1 = pnand %p166_p0, %p160_p11 }
  0x21   :  { %170 = shalt.err (!%p167_p1)
}
  0x22   :  { %33 = dma.hbm_to_vmem [thread:$0]  %s257_s1, 256, %s28_s24, [#allocation6], %s200_s19, %s200_s19, %s201_s20  }
  0x23   :  { %193 = dma.done.wait [#allocation3], 256  }
  0x24   :  { %194 = vsyncadd [#allocation3], 4294967040 }
  0x25   :  { %195 = dma.done.wait [#allocation6], 256  }
  0x26   :  { %196 = vsyncadd [#allocation6], 4294967040  ;;  %v40_v0 = vld [vmem:[#allocation2] sm:$0xff]  ;;  %v41_v1 = vld [vmem:[#allocation2 + $0x8] sm:$0xff]  ;;  %v203_v35 = vmov 0.75   ;;  %s204_s1 = smov [#allocation7]  }
  0x27   :  { %v44_v2 = vand.u32 2147483647, %v40_v0  ;;  %v45_v3 = vand.u32 2147483647, %v41_v1  ;;  %v42_v12 = vld [vmem:[#allocation5] sm:$0xff]  ;;  %v43_v13 = vld [vmem:[#allocation5 + $0x8] sm:$0xff] }
  0x28   :  { %v58_v14 = vmax.f32 %v40_v0, 0.0  ;;  %v60_v15 = vmul.f32 %v42_v12, %v40_v0  ;;  %v59_v16 = vmax.f32 %v41_v1, 0.0  ;;  %v61_v17 = vmul.f32 %v43_v13, %v41_v1  ;;  %s99_s6 = sshll.u32 %s204_s1, 4  ;;  %s100_s6 = int_to_ptr.vmem [resolvable:$true] %s99_s6 }
  0x29   :  { %v46_v4 = vsub.f32 0.0, %v44_v2  ;;  %v47_v5 = vsub.f32 0.0, %v45_v3  ;;  %vm70_vm0 = vcmp.ge.f32.partialorder %v40_v0, 0.0  ;;  %vm71_vm1 = vcmp.ge.f32.partialorder %v41_v1, 0.0  ;;  %s171_s7 = scalar_lea.vmem %s100_s6, 128  ;;  %p176_p3 = scmp.lt.s32.totalorder %s100_s6, %s100_s6 }
  0x2a   :  { %v62_v21 = vsub.f32 %v58_v14, %v60_v15  ;;  %v63_v24 = vsub.f32 %v59_v16, %v61_v17  ;;  %vm76_vm2 = vcmp.eq.f32.partialorder %v42_v12, 1.0  ;;  %vm77_vm3 = vcmp.eq.f32.partialorder %v43_v13, 1.0  ;;  %p172_p2 = scmp.ne.s32.totalorder %s100_s6, %s171_s7  ;;  %p177_p4 = scmp.lt.s32.totalorder %s171_s7, %s171_s7 }
  0x2b   :  { %v48_v6 = vmul.f32 1.442695, %v46_v4  ;;  %v50_v7 = vmul.f32 1.442695, %v47_v5  ;;  %v82_v36 = vsel %vm76_vm2, 0.25, %v203_v35  ;;  %v83_v39 = vsel %vm77_vm3, 0.25, %v203_v35 }
  0x2c   :  { %p178_p5 = por %p177_p4, %p176_p3 }
  0x2d   :  { %115 = vpow2.f32 %v48_v6 }
  0x2e   :  { %117 = vpow2.f32 %v50_v7  ;;  %p179_p6 = pnand %p178_p5, %p172_p2 }
  0x37   :  { %v116_v8 = vpop.eup %115 }
  0x38   :  { %v118_v9 = vpop.eup %117  ;;  %v52_v10 = vadd.f32 1.0, %v116_v8 }
  0x39   :  { %v53_v11 = vadd.f32 1.0, %v118_v9 }
  0x3a   :  { %119 = vlog2.f32 %v52_v10 }
  0x3b   :  { %121 = vlog2.f32 %v53_v11 }
  0x3c   :  { %123 = vrcp.f32 %v52_v10 }
  0x3d   :  { %125 = vrcp.f32 %v53_v11 }
  0x44   :  { %v120_v18 = vpop.eup %119 }
  0x45   :  { %v122_v19 = vpop.eup %121  ;;  %v55_v20 = vmul.f32 0.6931472, %v120_v18 }
  0x46   :  { %v124_v22 = vpop.eup %123  ;;  %v57_v23 = vmul.f32 0.6931472, %v122_v19 }
  0x47   :  { %v126_v25 = vpop.eup %125  ;;  %v72_v26 = vmul.f32 %v124_v22, %v116_v8  ;;  %v64_v28 = vadd.f32 %v62_v21, %v55_v20 }
  0x48   :  { %v73_v27 = vmul.f32 %v126_v25, %v118_v9  ;;  %v65_v30 = vadd.f32 %v63_v24, %v57_v23 }
  0x49   :  { %v74_v29 = vsel %vm70_vm0, %v124_v22, %v72_v26  ;;  %v66_v37 = vmin.f32 %v64_v28, 100.0 }
  0x4a   :  { %v75_v31 = vsel %vm71_vm1, %v126_v25, %v73_v27  ;;  %v78_v32 = vsub.f32 1.0, %v74_v29  ;;  %v67_v41 = vmin.f32 %v65_v30, 100.0 }
  0x4b   :  { %v79_v33 = vsub.f32 1.0, %v75_v31 }
  0x4c   :  { %v80_v34 = vsel %vm76_vm2, %v78_v32, %v74_v29 }
  0x4d   :  { %v81_v38 = vsel %vm77_vm3, %v79_v33, %v75_v31  ;;  %v84_v40 = vmul.f32 %v80_v34, %v80_v34 }
  0x4e   :  { %v85_v42 = vmul.f32 %v81_v38, %v81_v38 }
  0x4f   :  { %v86_v43 = vmul.f32 %v84_v40, %v82_v36 }
  0x50   :  { %v87_v44 = vmul.f32 %v85_v42, %v83_v39 }
  0x51   :  { %v88_v45 = vmul.f32 %v86_v43, %v66_v37 }
  0x52   :  { %v89_v46 = vmul.f32 %v87_v44, %v67_v41 }
  0x54   :  { %v90_v47 = vadd.f32 %v89_v46, %v88_v45 }
  0x56   :  { %92 = vst [vmem:[#allocation7] sm:$0xff] %v90_v47 }
  0x57   :  { %182 = shalt.err (!%p179_p6)
}
  0x58   :  { %s183_s10 = scalar_lea.hbm %s258_s2, 128 }
  0x59   :  { %p184_p7 = scmp.ne.s32.totalorder %s258_s2, %s183_s10  ;;  %p187_p8 = scmp.lt.u32.totalorder %s183_s10, %s258_s2 }
  0x5b   :  { %p189_p9 = pnand %p187_p8, %p184_p7 }
  0x5d   :  { %192 = shalt.err (!%p189_p9)
}
  0x5e   :  { %102 = dma.vmem_to_hbm [thread:$0]  %s100_s6, 128, %s258_s2, [#allocation4]  }
  0x5f   :  { %197 = dma.done.wait [#allocation4], 128  }
  0x60   :  { %198 = vsyncadd [#allocation4], 4294967168 }
  0x61   :  { %106 = vsyncpa [#allocation3], 1 }
  0x62   :  { %107 = vsyncpa [#allocation6], 1 }
  0x63   :  { %108 = vsyncpa [#allocation4], 1 }

</bundles_post_ra>
